<compile_context>
chip_gen: v7x
topology: tpu7x:2x2x1
jax: 0.10.0
libtpu: 0.0.40
codegen_flags: <defaults>
</compile_context>

<pallas_src>
import functools

import jax
import jax.numpy as jnp
from jax.experimental import pallas as pl
from jax.experimental.pallas import tpu as pltpu

EPS = 1e-5


def _round_up(a, m):
    return -(-a // m) * m


def _vmem_capacity_bytes():
    """Physical VMEM of the local TPU; conservative fallback = v7x (64 MiB)."""
    try:
        cap = int(getattr(pltpu.get_tpu_info(), "vmem_capacity_bytes", 0))
        if cap > 0:
            return cap
    except Exception:
        pass
    return 64 * 1024 * 1024


def _per_channel_block_bytes(v, j, nt, in_itemsize, out_itemsize):
    """Double-buffered, padding-aware VMEM bytes of one channel's in+out blocks."""
    nt_pad = _round_up(nt, 128)                                # lane padding
    v_pad = _round_up(v, 8 if in_itemsize >= 4 else 16)        # sublane padding
    j_pad = _round_up(j, 8 if out_itemsize >= 4 else 16)
    x_blk = 2 * v_pad * nt_pad * in_itemsize                   # Buffered(2) input
    o_blk = 2 * j_pad * nt_pad * out_itemsize                  # Buffered(2) output
    return x_blk + o_blk


def _fixed_vmem_bytes(v, j, nt):
    """Group-size-independent VMEM: f32 intermediates of ONE channel + proj."""
    nt_pad = _round_up(nt, 128)
    j_pad = _round_up(j, 8)
    interm = 4 * j_pad * nt_pad * 4            # y, d, y_hat, cast-out (f32)
    proj = 2 * _round_up(j, 8) * _round_up(v, 128) * 4
    return interm + proj


def _pick_channel_group(c, per_channel, fixed, budget):
    """Largest divisor of C fitting the budget, preferring >=4 grid steps
    (>=2 per v7x TensorCore), then >=2, then whatever fits."""
    divisors = [d for d in range(1, c + 1) if c % d == 0]
    feasible = [d for d in divisors if fixed + d * per_channel <= budget] or [1]
    for min_steps in (4, 2, 1):
        cands = [d for d in feasible if c // d >= min_steps]
        if cands:
            return max(cands)
    return max(feasible)


def _joint_project_kernel(xt_ref, pt_ref, gamma_ref, beta_ref, o_ref, *, cg, eps):
    # xt_ref : (Cg, V, NT)  lane-dense input block (NT = N*T on lanes)
    # pt_ref : (J, V)       transposed projection matrix, shared across steps
    # gamma/beta : (C,)     SMEM per-channel affine parameters
    # o_ref  : (Cg, J, NT)  lane-dense output block
    c0 = pl.program_id(0) * cg
    j, nt = o_ref.shape[1], o_ref.shape[2]
    inv_count = 1.0 / float(j * nt)            # BatchNorm2d count = N*T*J per channel

    pt = pt_ref[...]                           # native dtype straight to the MXU

    for i in range(cg):                        # one channel's f32 tile live at a time
        x_c = xt_ref[i]                        # (V, NT), native dtype
        y = jnp.dot(pt, x_c, preferred_element_type=jnp.float32)   # (J, NT) f32
        mean = jnp.sum(y) * inv_count
        d = y - mean                           # reused for var and normalization
        var = jnp.sum(d * d) * inv_count       # biased variance (training-mode BN)
        y_hat = d * jax.lax.rsqrt(var + eps)
        o_ref[i] = (y_hat * gamma_ref[c0 + i] + beta_ref[c0 + i]).astype(o_ref.dtype)


def joint_project(x, proj_mat, gamma, beta):
    """JointProject forward: x (N, C, T, V) -> BN(matmul(x, proj)): (N, C, T, J)."""
    n, c, t, v = x.shape
    j = proj_mat.shape[1]
    nt = n * t

    # Lane-dense layouts (one-time wrapper layout plumbing):
    #   x   (N, C, T, V) -> (C, V, N*T)  : N*T on lanes, V on sublanes
    #   out                  (C, J, N*T) : unmasked lane-dense stores in-kernel
    xt = jnp.transpose(x, (1, 3, 0, 2)).reshape(c, v, nt)
    pt = jnp.transpose(proj_mat)                                  # (J, V)

    cap = _vmem_capacity_bytes()
    vmem_limit = int(cap * 0.75)               # generation-aware scoped-VMEM limit
    block_budget = int(cap * 0.50)             # headroom for compiler scratch / slack

    per_channel = _per_channel_block_bytes(v, j, nt, x.dtype.itemsize, x.dtype.itemsize)
    fixed = _fixed_vmem_bytes(v, j, nt)
    cg = _pick_channel_group(c, per_channel, fixed, block_budget)
    # TODO(synk): for extreme N*T where even one channel's (V, N*T) block exceeds
    # the budget, add an NT grid axis with sum/sum-of-squares accumulators
    # finalized under pl.when on the last NT tile.
    # TODO(synk): BatchNorm running_mean/running_var buffer updates (training-mode
    # side effect) are not emitted; only the normalized output is returned.

    kernel = functools.partial(_joint_project_kernel, cg=cg, eps=EPS)

    itemsize = x.dtype.itemsize
    cost = pl.CostEstimate(
        flops=2 * n * c * t * v * j,
        transcendentals=0,
        bytes_accessed=(n * c * t * v * itemsize            # x read
                        + n * c * t * j * itemsize          # out write
                        + v * j * proj_mat.dtype.itemsize   # proj read
                        + 2 * c * 4),                       # gamma/beta
    )

    out = pl.pallas_call(
        kernel,
        out_shape=jax.ShapeDtypeStruct((c, j, nt), x.dtype),
        grid_spec=pltpu.PrefetchScalarGridSpec(
            num_scalar_prefetch=0,
            grid=(c // cg,),
            in_specs=[
                # Last two block dims equal the full (V, NT) / (J, V) extents,
                # so the (8, 128) rule is satisfied for any Cg.
                pl.BlockSpec((cg, v, nt), lambda i: (i, 0, 0)),
                pl.BlockSpec((j, v), lambda i: (0, 0)),
                pl.BlockSpec(memory_space=pltpu.MemorySpace.SMEM),
                pl.BlockSpec(memory_space=pltpu.MemorySpace.SMEM),
            ],
            out_specs=pl.BlockSpec((cg, j, nt), lambda i: (i, 0, 0)),
        ),
        compiler_params=pltpu.CompilerParams(
            dimension_semantics=("parallel",),
            vmem_limit_bytes=vmem_limit,
        ),
        cost_estimate=cost,
    )(xt, pt, gamma, beta)

    # Restore the PyTorch layout (N, C, T, J).
    return jnp.transpose(out.reshape(c, j, n, t), (2, 0, 3, 1))


def _reference(x, proj_mat, gamma, beta):
    n, c, t, v = x.shape
    y = jnp.matmul(x.reshape(n, c * t, v).astype(jnp.float32),
                   proj_mat.astype(jnp.float32))
    y = y.reshape(n, c, t, -1)
    mean = jnp.mean(y, axis=(0, 2, 3), keepdims=True)
    var = jnp.mean(jnp.square(y - mean), axis=(0, 2, 3), keepdims=True)
    y = (y - mean) * jax.lax.rsqrt(var + EPS)
    return y * gamma[None, :, None, None] + beta[None, :, None, None]


if __name__ == "__main__":
    # Small shapes consistent with the module: in_joints=25, out_joints=15.
    N, C, T, V_IN, V_OUT = 2, 4, 16, 25, 15

    key = jax.random.PRNGKey(0)
    kx, kp = jax.random.split(key)

    x = jax.random.normal(kx, (N, C, T, V_IN), dtype=jnp.float32)

    # kaiming_normal_ on a (in_joints, out_joints) 2-D tensor:
    # fan_in = size(1) = out_joints, std = sqrt(2 / fan_in)
    proj_mat = jax.random.normal(kp, (V_IN, V_OUT), dtype=jnp.float32) * \
        jnp.sqrt(2.0 / V_OUT)

    # constant_init(bn, 1): weight = 1, bias = 0
    gamma = jnp.ones((C,), dtype=jnp.float32)
    beta = jnp.zeros((C,), dtype=jnp.float32)

    out = joint_project(x, proj_mat, gamma, beta)
    out = jax.block_until_ready(out)

    ref = _reference(x, proj_mat, gamma, beta)
    assert out.shape == (N, C, T, V_OUT)
    # Outputs are BatchNorm-normalized (O(1)); 1e-3 catches any real layout /
    # semantics bug while tolerating MXU-vs-XLA matmul precision differences.
    assert jnp.allclose(out, ref, atol=1e-3, rtol=1e-3)

    print("KERNEL_OK")
</pallas_src>

<mosaic_0001>
module attributes {stable_mosaic.version = 11 : i64} {
  func.func @_joint_project_kernel(%arg0: i32, %arg1: memref<1x25x32xf32, #tpu.memory_space<vmem>>, %arg2: memref<15x25xf32, #tpu.memory_space<vmem>>, %arg3: memref<4xf32, #tpu.memory_space<smem>>, %arg4: memref<4xf32, #tpu.memory_space<smem>>, %arg5: memref<1x15x32xf32, #tpu.memory_space<vmem>>) attributes {dimension_semantics = [#tpu.dimension_semantics<parallel>], iteration_bounds = array<i64: 4>, scalar_prefetch = 0 : i64, scratch_operands = 0 : i64, tpu.core_type = #tpu.core_type<tc>, window_params = [{transform_indices = @transform_0, window_bounds = array<i64: 1, 25, 32>}, {pipeline_mode = #tpu.pipeline_mode<synchronous>, transform_indices = @transform_1, window_bounds = array<i64: 15, 25>}, {transform_indices = @transform_2, window_bounds = array<i64: 4>}, {transform_indices = @transform_3, window_bounds = array<i64: 4>}, {transform_indices = @transform_4, window_bounds = array<i64: 1, 15, 32>}]} {
    %c1_i32 = arith.constant 1 : i32
    %0 = arith.muli %arg0, %c1_i32 : i32
    %c0 = arith.constant 0 : index
    %c0_0 = arith.constant 0 : index
    %1 = vector.load %arg2[%c0, %c0_0] : memref<15x25xf32, #tpu.memory_space<vmem>>, vector<15x25xf32>
    %c0_1 = arith.constant 0 : index
    %c0_2 = arith.constant 0 : index
    %c0_3 = arith.constant 0 : index
    %2 = vector.load %arg1[%c0_1, %c0_2, %c0_3] : memref<1x25x32xf32, #tpu.memory_space<vmem>>, vector<1x25x32xf32>
    %3 = vector.shape_cast %2 : vector<1x25x32xf32> to vector<25x32xf32>
    %cst = arith.constant dense<0.000000e+00> : vector<15x32xf32>
    %4 = tpu.matmul %1, %3, %cst {dimension_numbers = #tpu.dot_dimension_numbers<[1], [0], [0], [1], [0, 0, 1, 1], [], []>} : vector<15x25xf32>, vector<25x32xf32>, vector<15x32xf32> -> vector<15x32xf32>
    %5 = vector.shape_cast %4 : vector<15x32xf32> to vector<1x15x32xf32>
    %cst_4 = arith.constant dense<0.000000e+00> : vector<1xf32>
    %6 = vector.multi_reduction <add>, %5, %cst_4 [1, 2] : vector<1x15x32xf32> to vector<1xf32>
    %7 = vector.shape_cast %6 : vector<1xf32> to vector<1x1x1xf32>
    %8 = vector.extract %7[0, 0, 0] : f32 from vector<1x1x1xf32>
    %cst_5 = arith.constant 0.00208333344 : f32
    %9 = arith.mulf %8, %cst_5 : f32
    %10 = vector.broadcast %9 : f32 to vector<15x32xf32>
    %11 = arith.subf %4, %10 : vector<15x32xf32>
    %12 = arith.mulf %11, %11 : vector<15x32xf32>
    %13 = vector.shape_cast %12 : vector<15x32xf32> to vector<1x15x32xf32>
    %cst_6 = arith.constant dense<0.000000e+00> : vector<1xf32>
    %14 = vector.multi_reduction <add>, %13, %cst_6 [1, 2] : vector<1x15x32xf32> to vector<1xf32>
    %15 = vector.shape_cast %14 : vector<1xf32> to vector<1x1x1xf32>
    %16 = vector.extract %15[0, 0, 0] : f32 from vector<1x1x1xf32>
    %cst_7 = arith.constant 0.00208333344 : f32
    %17 = arith.mulf %16, %cst_7 : f32
    %cst_8 = arith.constant 9.99999974E-6 : f32
    %18 = arith.addf %17, %cst_8 : f32
    %19 = math.rsqrt %18 : f32
    %20 = vector.broadcast %19 : f32 to vector<15x32xf32>
    %21 = arith.mulf %11, %20 : vector<15x32xf32>
    %c0_i32 = arith.constant 0 : i32
    %22 = arith.addi %0, %c0_i32 : i32
    %23 = arith.index_cast %22 : i32 to index
    %24 = memref.load %arg3[%23] : memref<4xf32, #tpu.memory_space<smem>>
    %25 = vector.broadcast %24 : f32 to vector<15x32xf32>
    %26 = arith.mulf %21, %25 : vector<15x32xf32>
    %c0_i32_9 = arith.constant 0 : i32
    %27 = arith.addi %0, %c0_i32_9 : i32
    %28 = arith.index_cast %27 : i32 to index
    %29 = memref.load %arg4[%28] : memref<4xf32, #tpu.memory_space<smem>>
    %30 = vector.broadcast %29 : f32 to vector<15x32xf32>
    %31 = arith.addf %26, %30 : vector<15x32xf32>
    %c0_10 = arith.constant 0 : index
    %c0_11 = arith.constant 0 : index
    %c0_12 = arith.constant 0 : index
    %32 = vector.load %arg5[%c0_10, %c0_11, %c0_12] : memref<1x15x32xf32, #tpu.memory_space<vmem>>, vector<1x15x32xf32>
    %33 = vector.shape_cast %32 : vector<1x15x32xf32> to vector<15x32xf32>
    %34 = vector.shape_cast %31 : vector<15x32xf32> to vector<1x15x32xf32>
    tpu.vector_store %arg5[%c0_10, %c0_11, %c0_12], %34 {strides = array<i32>} : memref<1x15x32xf32, #tpu.memory_space<vmem>>, vector<1x15x32xf32>,
    return
  }
  func.func @transform_0(%arg0: i32) -> (i32, i32, i32) {
    %c0_i32 = arith.constant 0 : i32
    %c0_i32_0 = arith.constant 0 : i32
    %c0_i32_1 = arith.constant 0 : i32
    return %arg0, %c0_i32, %c0_i32_0 : i32, i32, i32
  }
  func.func @transform_1(%arg0: i32) -> (i32, i32) {
    %c0_i32 = arith.constant 0 : i32
    %c0_i32_0 = arith.constant 0 : i32
    %c0_i32_1 = arith.constant 0 : i32
    return %c0_i32, %c0_i32_0 : i32, i32
  }
  func.func @transform_2(%arg0: i32) -> i32 {
    %c0_i32 = arith.constant 0 : i32
    %c0_i32_0 = arith.constant 0 : i32
    return %c0_i32 : i32
  }
  func.func @transform_3(%arg0: i32) -> i32 {
    %c0_i32 = arith.constant 0 : i32
    %c0_i32_0 = arith.constant 0 : i32
    return %c0_i32 : i32
  }
  func.func @transform_4(%arg0: i32) -> (i32, i32, i32) {
    %c0_i32 = arith.constant 0 : i32
    %c0_i32_0 = arith.constant 0 : i32
    %c0_i32_1 = arith.constant 0 : i32
    return %arg0, %c0_i32, %c0_i32_0 : i32, i32, i32
  }
}

</mosaic_0001>

<bundles_post_ra>
// kernel: tpu_custom_call.1
= control target key start
LH: loop header
LB: loop body
LE: loop exit
PB: predicated region body
PF: predicated region fallthrough
CT: control target
= control target key end

     0   :  { %9 = vsyncpa [#allocation3], 0  ;;  %s679_s0 = inlined_call_operand.vmem [shape: f32[4,25,32], index: 0, kind: input, shape index: {}]   ;;  %s680_s1 = inlined_call_operand.vmem [shape: f32[15,25], index: 1, kind: input, shape index: {}]   ;;  %s681_s2 = inlined_call_operand.vmem [shape: f32[4], index: 2, kind: input, shape index: {}]   ;;  %s682_s3 = inlined_call_operand.vmem [shape: f32[4], index: 3, kind: input, shape index: {}]   ;;  %s683_s4 = inlined_call_operand.vmem [shape: f32[4,15,32], index: 4, kind: output, shape index: {}]  }
   0x1   :  { %10 = vsyncpa [#allocation5], 0  ;;  %s603_s15 = smov 0  }
   0x2 LB: > { %s609_s16 = sadd.s32 4294967295, %s573_s15   ;;  %p446_p0 = scmp.ge.s32.totalorder %s573_s15, 1  ;;  %s573_s15 = sphi %s603_s15, %s16_s15  }
   0x3   : > { %p136_p1 = scmp.lt.s32.totalorder %s573_s15, 5  ;;  %s152_s19 = sshll.u32 %s681_s2, 4  ;;  %s153_s19 = int_to_ptr.vmem [resolvable:$true] %s152_s19 }
   0x4   : > { %p684_p3 = scmp.eq.s32.totalorder %s609_s16, 0  ;;  %s163_s23 = sshll.u32 %s682_s3, 4  ;;  %s164_s23 = int_to_ptr.vmem [resolvable:$true] %s163_s23 }
   0x5   : > { %p616_p2 = pnand %p446_p0, %p136_p1  ;;  %s529_s25 = scalar_lea.vmem %s153_s19, 16 }
   0x6   : > { %p530_p6 = scmp.ne.s32.totalorder %s153_s19, %s529_s25  ;;  %p537_p10 = scmp.lt.s32.totalorder %s153_s19, %s153_s19 }
   0x7   : > { %s686_s20 = scalar_select %p616_p2, 1, 0 }
   0x8   : > { %p505_p4 = pneg %p616_p2  ;;  %p538_p11 = scmp.lt.s32.totalorder %s529_s25, %s529_s25 }
   0xa   : > { %p628_p5 = pnand %p684_p3, %p505_p4  ;;  %p539_p12 = por %p538_p11, %p537_p10 }
   0xc   : > { %p531_p7 = pneg %p628_p5 }
   0xe   : > { %p532_p8 = pnand %p531_p7, %p530_p6 }
  0x10   : > { %p533_p9 = pneg %p532_p8 }
  0x12   : > { %p540_p13 = pnand %p539_p12, %p533_p9 }
  0x14   : > { %543 = shalt.err (!%p540_p13)
}
  0x15   : > { %s575_s26 = smov [#allocation2]   ;;  %s544_s27 = scalar_lea.vmem %s164_s23, 16 }
  0x16   : > { %508 = dma.vmem_to_smem (!%p628_p5), %s153_s19, 16, %s575_s26, [#allocation3]  }
  0x17   : > { %p545_p0 = scmp.ne.s32.totalorder %s164_s23, %s544_s27  ;;  %p552_p3 = scmp.lt.s32.totalorder %s164_s23, %s164_s23 }
  0x18   : > { %p553_p2 = scmp.lt.s32.totalorder %s544_s27, %s544_s27 }
  0x19   : > { %p547_p1 = pnand %p545_p0, %p531_p7 }
  0x1a   : > { %p554_p6 = por %p553_p2, %p552_p3 }
  0x1b   : > { %p548_p4 = pneg %p547_p1 }
  0x1d   : > { %p555_p8 = pnand %p554_p6, %p548_p4 }
  0x1f   : > { %558 = shalt.err (!%p555_p8)
}
  0x20   : > { %s576_s28 = smov [#allocation4]   ;;  %p688_p9 = scmp.ne.s32.totalorder %s686_s20, 0 }
  0x21   : > { %511 = dma.vmem_to_smem (!%p628_p5), %s164_s23, 16, %s576_s28, [#allocation5]  }
  0x22   : > { %184 = sbr.rel (%p688_p9) target bundleno = 774 (0x306), region = 36  ;;  %p689_p10 = scmp.eq.s32.totalorder (!%p688_p9), %s609_s16, 0 }
  0x29   : > { %564 = dma.done.wait (%p689_p10), [#allocation3], 16   ;;  %p690_p11 = pmov %p689_p10 }
  0x2a   : > { %p691_p7 = pmov %p689_p10 }
  0x2b   : > { %566 = vsyncadd (%p690_p11), [#allocation3], 4294967280 }
  0x2c   : > { %568 = dma.done.wait (%p691_p7), [#allocation5], 16   ;;  %p692_p2 = pmov %p691_p7 }
  0x2e   : > { %570 = vsyncadd (%p692_p2), [#allocation5], 4294967280 }
  0x2f   : > { %194 = sfence }
  0x30   : > { %p215_p3 = scmp.lt.s32.totalorder %s609_s16, 3  ;;  %v225_v0 = vld [vmem:[%s680_s1] sm:$0xff]  ;;  %vm231_vm0 = vcmask 203776   ;;  %vm238_vm1 = vcmask 1040384   ;;  %vm577_vm2 = vmmov 1   ;;  %vm319_vm4 = vcmask 260096  }
  0x31   : > { %478 = vmatprep.mubr.msk.f32.mxu0 %vm231_vm0, %v225_v0  ;;  %vm486_vm3 = vmpackc.low %vm238_vm1, %vm577_vm2  ;;  %v226_v7 = vld [vmem:[%s680_s1 + $0x8] sm:$0x7f]  ;;  %vm317_vm5 = vcmask 261120   ;;  %s357_s19 = sld [smem:[#allocation2 + %s609_s16]] }
  0x32   : > { %s654_s5 = scalar_select %p215_p3, %s609_s16, 3 }
  0x33   : > { %s361_s20 = sld [smem:[#allocation4 + %s609_s16]] }
  0x34   : > { %s462_s6 = sshll.u32 %s654_s5, 5  ;;  %s463_s22 = sshll.u32 %s654_s5, 4 }
  0x35   : > { %s219_s9 = scalar_lea.vmem %s679_s0, %s462_s6  ;;  %s224_s25 = scalar_lea.vmem %s683_s4, %s463_s22 }
  0x36   : > { %v227_v1 = vld [vmem:[%s219_s9] sm:$0xff]  ;;  %v228_v2 = vld [vmem:[%s219_s9 + $0x8] sm:$0xff]  ;;  %v229_v3 = vld [vmem:[%s219_s9 + $0x10] sm:$0xff] }
  0x37   : > { %v481_v4 = vpack.c.bf16 %v228_v2, %v227_v1  ;;  %v230_v5 = vld [vmem:[%s219_s9 + $0x18] sm:$0x1]  ;;  %v358_v38 = vstv %s357_s19 }
  0x38   : > { %v485_v6 = vpack.c.bf16 %v230_v5, %v229_v3 }
  0x39   : > { %482 = vmatprep.subr.bf16.mxu0 %v481_v4  ;;  %v362_v41 = vstv %s361_s20 }
  0x3a   : > { %484 = vmatpush3.bf16.msra.mxu0 %v481_v4 }
  0x3b   : > { %487 = vmatprep.subr.msk.bf16.mxu0 %vm486_vm3, %v485_v6 }
  0x3e   : > { %490 = vmatpush3.bf16.msk.msra.mxu0 %vm486_vm3, %v485_v6 }
  0x41   : > { %479 = vmatmul.mubr.msk.f32.vlgmr.msra.gmra.mrb[0].mxu0 %vm231_vm0, %v226_v7 }
 0x114   : > { %v480_v8 = vpop.f32.mrb[0].mxu0 }
 0x115   : > { %v308_v9 = vpop.f32.mrb[1].mxu0  ;;  %v320_v10 = vsel %vm319_vm4, %v480_v8, 0.0 }
 0x116   : > { %v318_v11 = vsel %vm317_vm5, %v308_v9, 0.0 }
 0x117   : > { %v321_v12 = vadd.f32 %v320_v10, %v318_v11 }
 0x119   : > { %322 = vadd.xlane.f32.xlu0 %v321_v12 }
 0x1a6   : > { %v323_v13 = vpop.xlane.xlu0 %322 }
 0x1a7   : > { %v324_v14 = vrot.slane %v323_v13, 4 }
 0x1a9   : > { %v325_v15 = vadd.f32 %v324_v14, %v323_v13 }
 0x1ab   : > { %v326_v16 = vrot.slane %v325_v15, 2 }
 0x1ad   : > { %v327_v17 = vadd.f32 %v326_v16, %v325_v15 }
 0x1af   : > { %v328_v18 = vrot.slane %v327_v17, 1 }
 0x1b1   : > { %v329_v19 = vadd.f32 %v328_v18, %v327_v17 }
 0x1b3   : > { %491 = vpush %v329_v19 }
 0x1e4   : > { %s492_s12 = spop %491 }
 0x1e5   : > { %s331_s13 = smul.f32 0.0020833334, %s492_s12 }
 0x1e7   : > { %v332_v20 = vstv %s331_s13 }
 0x1e8   : > { %v333_v21 = vsub.f32 %v308_v9, %v332_v20  ;;  %v334_v22 = vsub.f32 %v480_v8, %v332_v20 }
 0x1ea   : > { %v335_v23 = vmul.f32 %v333_v21, %v333_v21  ;;  %v336_v24 = vmul.f32 %v334_v22, %v334_v22 }
 0x1ec   : > { %v337_v25 = vsel %vm317_vm5, %v335_v23, 0.0  ;;  %v338_v26 = vsel %vm319_vm4, %v336_v24, 0.0 }
 0x1ed   : > { %v339_v27 = vadd.f32 %v338_v26, %v337_v25 }
 0x1ef   : > { %340 = vadd.xlane.f32.xlu0 %v339_v27 }
 0x27c   : > { %v341_v28 = vpop.xlane.xlu0 %340 }
 0x27d   : > { %v342_v29 = vrot.slane %v341_v28, 4 }
 0x27f   : > { %v343_v30 = vadd.f32 %v342_v29, %v341_v28 }
 0x281   : > { %v344_v31 = vrot.slane %v343_v30, 2 }
 0x283   : > { %v345_v32 = vadd.f32 %v344_v31, %v343_v30 }
 0x285   : > { %v346_v33 = vrot.slane %v345_v32, 1 }
 0x287   : > { %v347_v34 = vadd.f32 %v346_v33, %v345_v32 }
 0x289   : > { %493 = vpush %v347_v34 }
 0x2ba   : > { %s494_s14 = spop %493 }
 0x2bb   : > { %s349_s17 = smul.f32 0.0020833334, %s494_s14 }
 0x2bd   : > { %s350_s18 = sadd.f32 1e-05, %s349_s17 }
 0x2bf   : > { %v351_v35 = vstv %s350_s18 }
 0x2c0   : > { %527 = vrsqrt.f32 %v351_v35 }
 0x2ca   : > { %v528_v36 = vpop.eup %527 }
 0x2cb   : > { %495 = vpush %v528_v36 }
 0x2fc   : > { %s496_s21 = spop %495 }
 0x2fd   : > { %v354_v37 = vstv %s496_s21 }
 0x2fe   : > { %v355_v39 = vmul.f32 %v354_v37, %v333_v21  ;;  %v356_v40 = vmul.f32 %v354_v37, %v334_v22 }
 0x300   : > { %v359_v42 = vmul.f32 %v358_v38, %v355_v39  ;;  %v360_v43 = vmul.f32 %v358_v38, %v356_v40 }
 0x302   : > { %v363_v44 = vadd.f32 %v362_v41, %v359_v42  ;;  %v364_v45 = vadd.f32 %v362_v41, %v360_v43 }
 0x304   : > { %365 = vst.msk [vmem:[%s224_s25] sm:$0xff] %vm317_vm5, %v363_v44 }
 0x305   : > { %366 = vst.msk [vmem:[%s224_s25 + $0x8] sm:$0x7f] %vm319_vm4, %v364_v45 }
 0x306 PF: > { %s16_s15 = sadd.s32 1, %s573_s15  }
 0x307   : > { %p13_p5 = scmp.ge.s32.totalorder %s16_s15, 6  }
 0x309   :  { %15 = sbr.rel (!%p13_p5) target bundleno = 2 (0x2), region = 75 }
 0x310   :  { %388 = vsyncpa [#allocation3], 1 }
 0x311   :  { %390 = vsyncpa [#allocation3 + $0x1], 1 }
 0x312   :  { %391 = vsyncpa [#allocation5], 1 }

</bundles_post_ra>
